<compile_context>
chip_gen: v6e
topology: v6e:2x2x1
jax: 0.10.0
libtpu: 0.0.40
codegen_flags: <defaults>
</compile_context>

<pallas_src>
import functools

import jax
import jax.numpy as jnp
from jax import lax
from jax.experimental import pallas as pl
from jax.experimental.pallas import tpu as pltpu

_VMEM_LIMIT = 48 * 1024 * 1024  # explicit; fits v7x's 64 MiB physical VMEM


def _pick_tile(total, candidates):
    """Largest candidate that evenly divides `total`, else the full extent."""
    for c in candidates:
        if c <= total and total % c == 0:
            return c
    return total


# ----------------------------------------------------------------------------
# Tiled linear kernel: y = x @ w + b
# ----------------------------------------------------------------------------
def _linear_kernel(x_ref, w_ref, b_ref, o_ref):
    acc = jnp.dot(
        x_ref[...].astype(jnp.bfloat16),
        w_ref[...].astype(jnp.bfloat16),
        preferred_element_type=jnp.float32,
    )
    o_ref[...] = (acc + b_ref[...]).astype(o_ref.dtype)


def pallas_linear(x, w, b, *, block_m=None, block_n=None):
    M, K = x.shape
    K2, N = w.shape
    assert K == K2
    if block_m is None:
        block_m = _pick_tile(M, (512, 256, 128, 64, 32, 16, 8))
    if block_n is None:
        block_n = _pick_tile(N, (512, 256, 128))
    b2 = b.reshape(1, N)
    return pl.pallas_call(
        _linear_kernel,
        out_shape=jax.ShapeDtypeStruct((M, N), x.dtype),
        grid_spec=pltpu.PrefetchScalarGridSpec(
            num_scalar_prefetch=0,
            grid=(M // block_m, N // block_n),
            in_specs=[
                pl.BlockSpec((block_m, K), lambda i, j: (i, 0)),
                pl.BlockSpec((K, block_n), lambda i, j: (0, j)),
                pl.BlockSpec((1, block_n), lambda i, j: (0, j)),
            ],
            out_specs=pl.BlockSpec((block_m, block_n), lambda i, j: (i, j)),
        ),
        compiler_params=pltpu.CompilerParams(
            dimension_semantics=("parallel", "parallel"),
            vmem_limit_bytes=_VMEM_LIMIT,
        ),
    )(x, w, b2)


# ----------------------------------------------------------------------------
# Flash multi-head attention kernel (all heads of one batch per grid step)
# ----------------------------------------------------------------------------
def _flash_mha_kernel(q_ref, k_ref, v_ref, o_ref, acc_ref, m_ref, l_ref,
                      *, num_heads, head_dim):
    ki = pl.program_id(2)

    @pl.when(ki == 0)
    def _():
        m_ref[...] = jnp.full(m_ref.shape, -jnp.inf, dtype=m_ref.dtype)
        l_ref[...] = jnp.zeros(l_ref.shape, dtype=l_ref.dtype)
        acc_ref[...] = jnp.zeros(acc_ref.shape, dtype=acc_ref.dtype)

    # (tq, nh*hd) / (tk, nh*hd); attention scale already folded into q weights.
    q = q_ref[0].astype(jnp.bfloat16)
    k = k_ref[0].astype(jnp.bfloat16)
    v = v_ref[0].astype(jnp.bfloat16)

    for h in range(num_heads):  # static unrolled loop over heads
        sl = slice(h * head_dim, (h + 1) * head_dim)
        qh, kh, vh = q[:, sl], k[:, sl], v[:, sl]

        # scores (tq, tk): contract head_dim of q with head_dim of k (no .T)
        s = lax.dot_general(qh, kh, (((1,), (1,)), ((), ())),
                            preferred_element_type=jnp.float32)

        m_prev = m_ref[h]                       # (tq, 1) f32
        l_prev = l_ref[h]
        m_new = jnp.maximum(m_prev, jnp.max(s, axis=-1, keepdims=True))
        alpha = jnp.exp(m_prev - m_new)
        p = jnp.exp(s - m_new)                  # (tq, tk) f32
        l_ref[h] = alpha * l_prev + jnp.sum(p, axis=-1, keepdims=True)
        acc_ref[h] = alpha * acc_ref[h] + jnp.dot(
            p.astype(jnp.bfloat16), vh, preferred_element_type=jnp.float32)
        m_ref[h] = m_new

    @pl.when(ki == pl.num_programs(2) - 1)
    def _():
        outs = []
        for h in range(num_heads):
            inv_l = pl.reciprocal(l_ref[h], approx=True)   # EUP slot, ~free
            outs.append(acc_ref[h] * inv_l)                # (tq, hd) f32
        # lane-dense store: output block's last dim is nh*hd = dim
        o_ref[0] = jnp.concatenate(outs, axis=-1).astype(o_ref.dtype)


def pallas_flash_mha(qkv, *, num_heads, head_dim, block_q=None, block_kv=None):
    """qkv: (B, N, 3*dim) with channel layout [q(nh,hd), k(nh,hd), v(nh,hd)].

    Returns (B, N, dim) with channel layout (nh, hd) — exactly what the output
    projection consumes (no permutes needed).
    """
    B, N, three_dim = qkv.shape
    dim = num_heads * head_dim
    assert three_dim == 3 * dim
    if block_q is None:
        block_q = _pick_tile(N, (256, 128, 64, 32, 16, 8))
    if block_kv is None:
        block_kv = _pick_tile(N, (512, 256, 128, 64, 32, 16, 8))
    assert N % block_q == 0 and N % block_kv == 0

    if dim % 128 == 0:
        # zero-copy: q/k/v selected straight out of the fused qkv tensor by
        # the channel-block index of their BlockSpecs (no HBM slice/permute).
        q_arr = k_arr = v_arr = qkv
        q_map = lambda b, qi, ki: (b, qi, 0)
        k_map = lambda b, qi, ki: (b, ki, 1)
        v_map = lambda b, qi, ki: (b, ki, 2)
    else:
        # dim not lane-aligned: fall back to cheap contiguous channel slices so
        # every block's last dim equals the full array's last dim.
        q_arr = qkv[:, :, 0 * dim:1 * dim]
        k_arr = qkv[:, :, 1 * dim:2 * dim]
        v_arr = qkv[:, :, 2 * dim:3 * dim]
        q_map = lambda b, qi, ki: (b, qi, 0)
        k_map = lambda b, qi, ki: (b, ki, 0)
        v_map = lambda b, qi, ki: (b, ki, 0)

    kern = functools.partial(_flash_mha_kernel, num_heads=num_heads,
                             head_dim=head_dim)
    return pl.pallas_call(
        kern,
        out_shape=jax.ShapeDtypeStruct((B, N, dim), qkv.dtype),
        grid_spec=pltpu.PrefetchScalarGridSpec(
            num_scalar_prefetch=0,
            grid=(B, N // block_q, N // block_kv),
            in_specs=[
                pl.BlockSpec((1, block_q, dim), q_map),
                pl.BlockSpec((1, block_kv, dim), k_map),
                pl.BlockSpec((1, block_kv, dim), v_map),
            ],
            out_specs=pl.BlockSpec((1, block_q, dim),
                                   lambda b, qi, ki: (b, qi, 0)),
            scratch_shapes=[
                pltpu.VMEM((num_heads, block_q, head_dim), jnp.float32),  # acc
                pltpu.VMEM((num_heads, block_q, 1), jnp.float32),         # m
                pltpu.VMEM((num_heads, block_q, 1), jnp.float32),         # l
            ],
        ),
        compiler_params=pltpu.CompilerParams(
            dimension_semantics=("parallel", "parallel", "arbitrary"),
            vmem_limit_bytes=_VMEM_LIMIT,
        ),
    )(q_arr, k_arr, v_arr)


# ----------------------------------------------------------------------------
# MultiScaleAttention forward (q_pool=None path)
# ----------------------------------------------------------------------------
def prepare_params(params, *, dim_out, num_heads):
    """Fold the 1/sqrt(head_dim) attention scale into the q rows of the qkv
    projection (one-time weight transform; removes a per-grid-step multiply)."""
    head_dim = dim_out // num_heads
    scale = head_dim ** (-0.5)
    dt = params["w_qkv"].dtype
    col_scale = jnp.concatenate([
        jnp.full((dim_out,), scale, dtype=dt),
        jnp.ones((2 * dim_out,), dtype=dt),
    ])
    return {
        "w_qkv": params["w_qkv"] * col_scale[None, :],
        "b_qkv": params["b_qkv"] * col_scale,
        "w_proj": params["w_proj"],
        "b_proj": params["b_proj"],
    }


def multiscale_attention_forward(x, prepared_params, num_heads,
                                 *, block_q=None, block_kv=None):
    """x: (B, H, W, dim) float32 -> (B, H, W, dim_out)."""
    # TODO(synk): optional q_pool (nn.MaxPool2d) query-downsampling path is not
    # implemented (module default q_pool=None).
    B, H, W, _ = x.shape
    dim_out = prepared_params["w_qkv"].shape[1] // 3
    head_dim = dim_out // num_heads
    N = H * W

    x_flat = x.reshape(B * N, x.shape[-1])
    qkv = pallas_linear(x_flat, prepared_params["w_qkv"],
                        prepared_params["b_qkv"])          # (B*N, 3*dim_out)
    qkv = qkv.reshape(B, N, 3 * dim_out)    # heads stay interleaved: no permute

    attn = pallas_flash_mha(qkv, num_heads=num_heads, head_dim=head_dim,
                            block_q=block_q, block_kv=block_kv)  # (B, N, dim)

    out = pallas_linear(attn.reshape(B * N, dim_out),
                        prepared_params["w_proj"], prepared_params["b_proj"])
    return out.reshape(B, H, W, dim_out)


def reference_forward(x, params, num_heads):
    """Pure-JAX f32 reference mirroring the PyTorch forward (q_pool=None)."""
    B, H, W, dim = x.shape
    dim_out = params["w_qkv"].shape[1] // 3
    head_dim = dim_out // num_heads
    scale = head_dim ** (-0.5)
    N = H * W

    qkv = x.reshape(B * N, dim) @ params["w_qkv"] + params["b_qkv"]
    qkv = qkv.reshape(B, N, 3, num_heads, head_dim)
    qkv = jnp.transpose(qkv, (2, 0, 3, 1, 4))            # (3, B, nh, N, hd)
    q, k, v = qkv[0], qkv[1], qkv[2]

    attn = jnp.einsum("bhnd,bhmd->bhnm", q * scale, k)
    attn = jax.nn.softmax(attn, axis=-1)
    out = jnp.einsum("bhnm,bhmd->bhnd", attn, v)
    out = jnp.transpose(out, (0, 2, 1, 3)).reshape(B * N, dim_out)
    out = out @ params["w_proj"] + params["b_proj"]
    return out.reshape(B, H, W, dim_out)


# ----------------------------------------------------------------------------
# Main
# ----------------------------------------------------------------------------
if __name__ == "__main__":
    # Small, module-consistent shapes; dim is a multiple of 128 so the fused
    # qkv channel-block indexing path is lane-aligned.
    B, H, W = 2, 8, 8
    dim, num_heads = 128, 4

    key = jax.random.PRNGKey(0)
    kx, kw1, kb1, kw2, kb2 = jax.random.split(key, 5)

    x = jax.random.normal(kx, (B, H, W, dim), dtype=jnp.float32)
    params = {
        "w_qkv": jax.random.normal(kw1, (dim, 3 * dim), dtype=jnp.float32) * 0.05,
        "b_qkv": jax.random.normal(kb1, (3 * dim,), dtype=jnp.float32) * 0.05,
        "w_proj": jax.random.normal(kw2, (dim, dim), dtype=jnp.float32) * 0.05,
        "b_proj": jax.random.normal(kb2, (dim,), dtype=jnp.float32) * 0.05,
    }

    prepared = prepare_params(params, dim_out=dim, num_heads=num_heads)

    # block_kv=32 -> 2 KV steps per (batch, q-block): exercises the online
    # softmax accumulation across the "arbitrary" grid axis.
    out = multiscale_attention_forward(x, prepared, num_heads,
                                       block_q=64, block_kv=32)
    out = jax.block_until_ready(out)

    ref = jax.block_until_ready(reference_forward(x, params, num_heads))
    assert out.shape == (B, H, W, dim)
    max_err = float(jnp.max(jnp.abs(out - ref)))
    # bf16 MXU operands with f32 accumulation -> looser tolerance than pure f32
    assert jnp.allclose(out, ref, atol=3e-2, rtol=3e-2), f"max abs err {max_err}"

    print("KERNEL_OK")
</pallas_src>

<mosaic_0001>
module attributes {stable_mosaic.version = 11 : i64} {
  func.func @_linear_kernel(%arg0: i32, %arg1: i32, %arg2: memref<128x128xf32, #tpu.memory_space<vmem>>, %arg3: memref<128x128xf32, #tpu.memory_space<vmem>>, %arg4: memref<1x128xf32, #tpu.memory_space<vmem>>, %arg5: memref<128x128xf32, #tpu.memory_space<vmem>>) attributes {dimension_semantics = [#tpu.dimension_semantics<parallel>, #tpu.dimension_semantics<parallel>], iteration_bounds = array<i64: 1, 3>, scalar_prefetch = 0 : i64, scratch_operands = 0 : i64, tpu.core_type = #tpu.core_type<tc>, window_params = [{transform_indices = @transform_0, window_bounds = array<i64: 128, 128>}, {transform_indices = @transform_1, window_bounds = array<i64: 128, 128>}, {transform_indices = @transform_2, window_bounds = array<i64: 1, 128>}, {transform_indices = @transform_3, window_bounds = array<i64: 128, 128>}]} {
    %c0 = arith.constant 0 : index
    %c0_0 = arith.constant 0 : index
    %0 = vector.load %arg2[%c0, %c0_0] : memref<128x128xf32, #tpu.memory_space<vmem>>, vector<128x128xf32>
    %1 = arith.truncf %0 : vector<128x128xf32> to vector<128x128xbf16>
    %c0_1 = arith.constant 0 : index
    %c0_2 = arith.constant 0 : index
    %2 = vector.load %arg3[%c0_1, %c0_2] : memref<128x128xf32, #tpu.memory_space<vmem>>, vector<128x128xf32>
    %3 = arith.truncf %2 : vector<128x128xf32> to vector<128x128xbf16>
    %cst = arith.constant dense<0.000000e+00> : vector<128x128xf32>
    %4 = tpu.matmul %1, %3, %cst {dimension_numbers = #tpu.dot_dimension_numbers<[1], [0], [0], [1], [0, 0, 1, 1], [], []>} : vector<128x128xbf16>, vector<128x128xbf16>, vector<128x128xf32> -> vector<128x128xf32>
    %c0_3 = arith.constant 0 : index
    %c0_4 = arith.constant 0 : index
    %5 = vector.load %arg4[%c0_3, %c0_4] : memref<1x128xf32, #tpu.memory_space<vmem>>, vector<1x128xf32>
    %6 = vector.broadcast %5 : vector<1x128xf32> to vector<128x128xf32>
    %7 = arith.addf %4, %6 : vector<128x128xf32>
    %c0_5 = arith.constant 0 : index
    %c0_6 = arith.constant 0 : index
    %8 = vector.load %arg5[%c0_5, %c0_6] : memref<128x128xf32, #tpu.memory_space<vmem>>, vector<128x128xf32>
    tpu.vector_store %arg5[%c0_5, %c0_6], %7 {strides = array<i32>} : memref<128x128xf32, #tpu.memory_space<vmem>>, vector<128x128xf32>,
    return
  }
  func.func @transform_0(%arg0: i32, %arg1: i32) -> (i32, i32) {
    %c0_i32 = arith.constant 0 : i32
    %c0_i32_0 = arith.constant 0 : i32
    return %arg0, %c0_i32 : i32, i32
  }
  func.func @transform_1(%arg0: i32, %arg1: i32) -> (i32, i32) {
    %c0_i32 = arith.constant 0 : i32
    %c0_i32_0 = arith.constant 0 : i32
    return %c0_i32, %arg1 : i32, i32
  }
  func.func @transform_2(%arg0: i32, %arg1: i32) -> (i32, i32) {
    %c0_i32 = arith.constant 0 : i32
    %c0_i32_0 = arith.constant 0 : i32
    return %c0_i32, %arg1 : i32, i32
  }
  func.func @transform_3(%arg0: i32, %arg1: i32) -> (i32, i32) {
    %c0_i32 = arith.constant 0 : i32
    return %arg0, %arg1 : i32, i32
  }
}

</mosaic_0001>

<bundles_post_ra>
// kernel: tpu_custom_call.1
= control target key start
LH: loop header
LB: loop body
LE: loop exit
PB: predicated region body
PF: predicated region fallthrough
CT: control target
= control target key end

     0   :  { %8 = vsyncpa [#allocation3], 0  ;;  %s1084_s0 = inlined_call_operand.hbm [shape: f32[128,128], index: 0, kind: input, shape index: {}]   ;;  %s1085_s1 = inlined_call_operand.hbm [shape: f32[128,384], index: 1, kind: input, shape index: {}]   ;;  %s1086_s2 = inlined_call_operand.vmem [shape: f32[1,384], index: 2, kind: input, shape index: {}]   ;;  %s1087_s3 = inlined_call_operand.hbm [shape: f32[128,384], index: 3, kind: output, shape index: {}]  }
   0x1   :  { %9 = vsyncpa [#allocation6], 0 }
   0x2   :  { %11 = vsyncpa [#allocation6 + $0x1], 0 }
   0x3   :  { %12 = vsyncpa [#allocation4], 0 }
   0x4   :  { %14 = vsyncpa [#allocation4 + $0x1], 0  ;;  %s860_s12 = smov 0   ;;  %s862_s13 = smov 0  }
   0x5   :  { %s864_s14 = smov 0   ;;  %s866_s15 = smov 0  }
   0x6   :  { %s868_s16 = smov 0   ;;  %s870_s17 = smov 0  }
   0x7 LB: > { %1093 = sst [smem:[#allocation11_spill]] %s809_s12  ;;  %s532_s18 = sadd.s32 4294967295, %s829_s17   ;;  %s829_s17 = sphi %s870_s17, %s20_s17   ;;  %s825_s16 = sphi %s868_s16, %s1114_s16   ;;  %s821_s15 = sphi %s866_s15, %s1113_s15   ;;  %s817_s14 = sphi %s864_s14, %s1112_s14   ;;  %s813_s13 = sphi %s862_s13, %s1111_s13   ;;  %s809_s12 = sphi %s860_s12, %s1110_s12  }
   0x8   : > { %s533_s19 = sadd.s32 4294967294, %s829_s17   ;;  %p72_p0 = scmp.ne.s32.totalorder %s817_s14, %s813_s13 }
   0x9   : > { %p73_p1 = scmp.eq.s32.totalorder %s829_s17, 0  ;;  %p78_p2 = scmp.ne.s32.totalorder %s813_s13, %s809_s12 }
   0xa   : > { %p897_p3 = scmp.eq.s32.totalorder %s532_s18, 0  ;;  %p130_p5 = scmp.eq.s32.totalorder %s532_s18, 2 }
   0xb   : > { %p901_p4 = por %p73_p1, %p72_p0  ;;  %p136_p7 = scmp.eq.s32.totalorder %s533_s19, 2 }
   0xc   : > { %p907_p6 = por %p897_p3, %p78_p2  ;;  %p911_p8 = por %p130_p5, %p72_p0 }
   0xd   : > { %p534_p9 = scmp.ge.s32.totalorder %s829_s17, 1  ;;  %p916_p10 = por %p136_p7, %p78_p2 }
   0xe   : > { %s1096_s22 = scalar_select %p907_p6, 1, 0 }
   0xf   : > { %s1097_s23 = scalar_select %p911_p8, 1, 0 }
  0x10   : > { %s1098_s24 = scalar_select %p916_p10, 1, 0 }
  0x11   : > { %p143_p11 = scmp.lt.s32.totalorder %s829_s17, 4  ;;  %s831_s26 = smov [#allocation2]  }
  0x12   : > { %1099 = sst [smem:[#allocation12_spill]] %s1098_s24  ;;  %s158_s27 = sshll.u32 %s831_s26, 4  ;;  %s159_s27 = int_to_ptr.vmem [resolvable:$true] %s158_s27 }
  0x13   : > { %p921_p12 = pnand %p534_p9, %p143_p11  ;;  %p633_p0 = scmp.lt.s32.totalorder %s829_s17, 3 }
  0x14   : > { %s29_s30 = sadd.s32 1, %s825_s16  ;;  %s702_s4 = scalar_lea.vmem %s159_s27, 2048 }
  0x15   : > { %p620_p13 = pneg %p921_p12  ;;  %p936_p2 = pnand %p633_p0, %p901_p4 }
  0x16   : > { %p703_p7 = scmp.ne.s32.totalorder %s159_s27, %s702_s4  ;;  %p710_p10 = scmp.lt.s32.totalorder %s159_s27, %s159_s27 }
  0x17   : > { %p930_p1 = pnand %p620_p13, %p897_p3  ;;  %p711_p8 = scmp.lt.s32.totalorder %s702_s4, %s702_s4 }
  0x19   : > { %p693_p5 = pneg %p930_p1  ;;  %p712_p6 = por %p711_p8, %p710_p10 }
  0x1b   : > { %p705_p9 = pnand %p703_p7, %p693_p5 }
  0x1d   : > { %p706_p11 = pneg %p705_p9 }
  0x1f   : > { %p713_p13 = pnand %p712_p6, %p706_p11 }
  0x21   : > { %716 = shalt.err (!%p713_p13)
}
  0x22   : > { %s1092_s5 = smov 128   ;;  %s833_s6 = smov 8  }
  0x23   : > { %623 = dma.hbm_to_vmem [thread:$0]  (!%p930_p1), %s1084_s0, 2048, %s159_s27, [#allocation3], %s1092_s5, %s1092_s5, %s833_s6  }
  0x24   : > { %p30_p4 = scmp.ge.s32.totalorder %s29_s30, 3  ;;  %s65_s9 = sadd.s32 1, %s817_s14 }
  0x25   : > { %s172_s10 = sand.u32 1, %s817_s14   ;;  %s538_s19 = sshll.u32 %s825_s16, 7 }
  0x26   : > { %s1116_s30 = smov (%p30_p4, %s29_s30), 0  ;;  %s537_s11 = sshll.u32 %s172_s10, 7 }
  0x27   : > { %s62_s18 = ssub.s32 %s825_s16, %s1116_s30  ;;  %s181_s28 = scalar_lea.hbm %s1085_s1, %s538_s19 }
  0x28   : > { %p63_p6 = scmp.eq.s32.totalorder %s62_s18, 0  ;;  %s176_s4 = scalar_lea.vmem [#allocation5], %s537_s11 }
  0x29   : > { %s182_s24 = sshll.u32 %s176_s4, 4  ;;  %s173_s27 = scalar_lea.sflag [#allocation6], %s172_s10  ;;  %s183_s24 = int_to_ptr.vmem [resolvable:$true] %s182_s24 }
  0x2a   : > { %s962_s12 = scalar_select %p63_p6, %s817_s14, %s65_s9  }
  0x2b   : > { %p719_p8 = pneg %p936_p2  ;;  %s730_s7 = scalar_lea.vmem %s183_s24, 2048 }
  0x2c   : > { %p731_p10 = scmp.ne.s32.totalorder %s183_s24, %s730_s7  ;;  %s834_s8 = smov [#allocation5]  }
  0x2d   : > { %s735_s5 = sshll.u32 %s834_s8, 4  ;;  %s736_s5 = int_to_ptr.vmem [resolvable:$false] %s735_s5 }
  0x2e   : > { %p733_p0 = pnand %p731_p10, %p719_p8  ;;  %s737_s18 = scalar_lea.vmem %s736_s5, 4096 }
  0x2f   : > { %p738_p5 = scmp.lt.s32.totalorder %s183_s24, %s736_s5  ;;  %p739_p7 = scmp.lt.s32.totalorder %s737_s18, %s730_s7 }
  0x30   : > { %p734_p1 = pneg %p733_p0 }
  0x31   : > { %p740_p9 = por %p739_p7, %p738_p5 }
  0x33   : > { %p741_p11 = pnand %p740_p9, %p734_p1 }
  0x35   : > { %744 = shalt.err (!%p741_p11)
}
  0x36   : > { %s835_s11 = smov 384   ;;  %s1103_s9 = smov 128  }
  0x37   : > { %627 = dma.hbm_to_vmem [thread:$0]  (!%p936_p2), %s181_s28, 2048, %s183_s24, %s173_s27, %s835_s11, %s1103_s9, %s833_s6  }
  0x38   : > { %200 = sbr.rel (%p921_p12) target bundleno = 325 (0x145), region = 32 }
  0x3d   : > { %796 = dma.done.wait (%p897_p3), [#allocation3], 2048  }
  0x3e   : > { %798 = vsyncadd (%p897_p3), [#allocation3], 4294965248  ;;  %s977_s5 = sand.u32 1, %s813_s13   ;;  %p1104_p2 = scmp.ne.s32.totalorder %s1096_s22, 0 }
  0x3f   : > { %s541_s29 = sshll.u32 %s977_s5, 7  ;;  %s207_s10 = scalar_lea.sflag [#allocation6], %s977_s5 }
  0x40   : > { %s983_s24 = scalar_lea.vmem [#allocation5], %s541_s29 }
  0x41   : > { %800 = dma.done.wait (%p1104_p2), %s207_s10, 2048  }
  0x42   : > { %802 = vsyncadd (%p1104_p2), %s207_s10, 4294965248  ;;  %v280_v0 = vld [vmem:[%s983_s24 + $0x70] sm:$0xff]  ;;  %v281_v1 = vld [vmem:[%s983_s24 + $0x78] sm:$0xff]  ;;  %p237_p3 = scmp.lt.s32.totalorder %s821_s15, 2  ;;  %s1012_s19 = scalar_lea.vmem [#allocation7], %s541_s29 }
  0x43   : > { %v278_v2 = vld [vmem:[%s983_s24 + $0x60] sm:$0xff]  ;;  %v289_v3 = vpack.c.bf16 %v281_v1, %v280_v0  ;;  %v279_v4 = vld [vmem:[%s983_s24 + $0x68] sm:$0xff]  ;;  %v276_v6 = vld [vmem:[%s983_s24 + $0x50] sm:$0xff]  ;;  %s545_s21 = sshll.u32 %s821_s15, 7  ;;  %s426_s26 = sshll.u32 %s1012_s19, 4  ;;  %s1033_s26 = int_to_ptr.vmem [resolvable:$true] %s426_s26 }
  0x44   : > { %v288_v5 = vpack.c.bf16 %v279_v4, %v278_v2  ;;  %v277_v7 = vld [vmem:[%s983_s24 + $0x58] sm:$0xff]  ;;  %v274_v9 = vld [vmem:[%s983_s24 + $0x40] sm:$0xff]  ;;  %v243_v11 = vld [vmem:[#allocation2 + $0x8] sm:$0xff]  ;;  %s238_s20 = scalar_select %p237_p3, %s821_s15, 2 }
  0x45   : > { %564 = vmatprep.subr.bf16.mxu0 %v289_v3  ;;  %596 = vmatprep.subr.bf16.mxu1 %v289_v3  ;;  %v287_v8 = vpack.c.bf16 %v277_v7, %v276_v6  ;;  %v242_v10 = vld [vmem:[#allocation2] sm:$0xff]  ;;  %v275_v12 = vld [vmem:[%s983_s24 + $0x48] sm:$0xff]  ;;  %v272_v18 = vld [vmem:[%s983_s24 + $0x30] sm:$0xff]  ;;  %s1031_s15 = scalar_lea.hbm %s1087_s3, %s545_s21  ;;  %s411_s27 = scalar_lea.sflag [#allocation4], %s977_s5 }
  0x46   : > { %565 = vmatpush3.bf16.msra.mxu0 %v289_v3  ;;  %604 = vmatpush3.bf16.msra.mxu1 %v289_v3  ;;  %v258_v13 = vpack.c.bf16 %v243_v11, %v242_v10  ;;  %v250_v14 = vld [vmem:[#allocation2 + $0x40] sm:$0xff]  ;;  %v251_v15 = vld [vmem:[#allocation2 + $0x48] sm:$0xff]  ;;  %v286_v17 = vpack.c.bf16 %v275_v12, %v274_v9  ;;  %v273_v19 = vld [vmem:[%s983_s24 + $0x38] sm:$0xff]  ;;  %s239_s6 = scalar_lea.vmem %s1086_s2, %s238_s20  ;;  %s745_s7 = scalar_lea.vmem %s1033_s26, 2048 }
  0x47   : > { %566 = vmatprep.subr.bf16.mxu0 %v288_v5  ;;  %597 = vmatprep.subr.bf16.mxu1 %v288_v5  ;;  %v262_v16 = vpack.c.bf16 %v251_v15, %v250_v14  ;;  %v285_v20 = vpack.c.bf16 %v273_v19, %v272_v18  ;;  %v270_v21 = vld [vmem:[%s983_s24 + $0x20] sm:$0xff]  ;;  %v271_v22 = vld [vmem:[%s983_s24 + $0x28] sm:$0xff]  ;;  %v268_v24 = vld [vmem:[%s983_s24 + $0x10] sm:$0xff]  ;;  %p746_p12 = scmp.ne.s32.totalorder %s1033_s26, %s745_s7  ;;  %p1105_p13 = scmp.ne.s32.totalorder %s1097_s23, 0 }
  0x48   : > { %580 = vmatprep.mubr.bf16.mxu0 %v258_v13  ;;  %v284_v23 = vpack.c.bf16 %v271_v22, %v270_v21  ;;  %v269_v25 = vld [vmem:[%s983_s24 + $0x18] sm:$0xff]  ;;  %v266_v27 = vld [vmem:[%s983_s24] sm:$0xff]  ;;  %v267_v28 = vld [vmem:[%s983_s24 + $0x8] sm:$0xff]  ;;  %s836_s8 = smov [#allocation7]  }
  0x49   : > { %588 = vmatprep.mubr.bf16.mxu1 %v262_v16  ;;  %v283_v26 = vpack.c.bf16 %v269_v25, %v268_v24  ;;  %v282_v29 = vpack.c.bf16 %v267_v28, %v266_v27  ;;  %v244_v30 = vld [vmem:[#allocation2 + $0x10] sm:$0xff]  ;;  %v245_v31 = vld [vmem:[#allocation2 + $0x18] sm:$0xff]  ;;  %v246_v34 = vld [vmem:[#allocation2 + $0x20] sm:$0xff]  ;;  %p747_p4 = pnand %p746_p12, %p1105_p13  ;;  %s749_s18 = sshll.u32 %s836_s8, 4  ;;  %s750_s18 = int_to_ptr.vmem [resolvable:$false] %s749_s18 }
  0x4a   : > { %567 = vmatpush3.bf16.msra.mxu0 %v288_v5  ;;  %605 = vmatpush3.bf16.msra.mxu1 %v288_v5  ;;  %v252_v32 = vld [vmem:[#allocation2 + $0x50] sm:$0xff]  ;;  %v253_v33 = vld [vmem:[#allocation2 + $0x58] sm:$0xff]  ;;  %v247_v35 = vld [vmem:[#allocation2 + $0x28] sm:$0xff]  ;;  %v259_v38 = vpack.c.bf16 %v245_v31, %v244_v30  ;;  %s751_s11 = scalar_lea.vmem %s750_s18, 4096  ;;  %p752_p8 = scmp.lt.s32.totalorder %s1033_s26, %s750_s18 }
  0x4b   : > { %568 = vmatprep.subr.bf16.mxu0 %v287_v8  ;;  %598 = vmatprep.subr.bf16.mxu1 %v287_v8  ;;  %v254_v36 = vld [vmem:[#allocation2 + $0x60] sm:$0xff]  ;;  %v255_v37 = vld [vmem:[#allocation2 + $0x68] sm:$0xff]  ;;  %v263_v39 = vpack.c.bf16 %v253_v33, %v252_v32  ;;  %v260_v40 = vpack.c.bf16 %v247_v35, %v246_v34  ;;  %v248_v42 = vld [vmem:[#allocation2 + $0x30] sm:$0xff]  ;;  %p748_p6 = pneg %p747_p4  ;;  %p753_p10 = scmp.lt.s32.totalorder %s751_s11, %s745_s7 }
  0x4c   : > { %v264_v41 = vpack.c.bf16 %v255_v37, %v254_v36  ;;  %v249_v43 = vld [vmem:[#allocation2 + $0x38] sm:$0xff]  ;;  %v256_v44 = vld [vmem:[#allocation2 + $0x70] sm:$0xff]  ;;  %v543_v48 = vld [vmem:[%s239_s6] ss:$0 sm:$0xff] }
  0x4d   : > { %v257_v45 = vld [vmem:[#allocation2 + $0x78] sm:$0xff]  ;;  %v261_v46 = vpack.c.bf16 %v249_v43, %v248_v42  ;;  %p754_p0 = por %p753_p10, %p752_p8 }
  0x4e   : > { %569 = vmatpush3.bf16.msra.mxu0 %v287_v8  ;;  %606 = vmatpush3.bf16.msra.mxu1 %v287_v8  ;;  %v265_v47 = vpack.c.bf16 %v257_v45, %v256_v44 }
  0x4f   : > { %570 = vmatprep.subr.bf16.mxu0 %v286_v17  ;;  %599 = vmatprep.subr.bf16.mxu1 %v286_v17  ;;  %p755_p1 = pnand %p754_p0, %p748_p6 }
  0x52   : > { %571 = vmatpush3.bf16.msra.mxu0 %v286_v17  ;;  %607 = vmatpush3.bf16.msra.mxu1 %v286_v17 }
  0x53   : > { %572 = vmatprep.subr.bf16.mxu0 %v285_v20  ;;  %600 = vmatprep.subr.bf16.mxu1 %v285_v20 }
  0x56   : > { %573 = vmatpush3.bf16.msra.mxu0 %v285_v20  ;;  %608 = vmatpush3.bf16.msra.mxu1 %v285_v20 }
  0x57   : > { %574 = vmatprep.subr.bf16.mxu0 %v284_v23  ;;  %601 = vmatprep.subr.bf16.mxu1 %v284_v23 }
  0x5a   : > { %575 = vmatpush3.bf16.msra.mxu0 %v284_v23  ;;  %609 = vmatpush3.bf16.msra.mxu1 %v284_v23 }
  0x5b   : > { %576 = vmatprep.subr.bf16.mxu0 %v283_v26  ;;  %602 = vmatprep.subr.bf16.mxu1 %v283_v26 }
  0x5e   : > { %577 = vmatpush3.bf16.msra.mxu0 %v283_v26  ;;  %610 = vmatpush3.bf16.msra.mxu1 %v283_v26 }
  0x5f   : > { %578 = vmatprep.subr.bf16.mxu0 %v282_v29  ;;  %603 = vmatprep.subr.bf16.mxu1 %v282_v29 }
  0x62   : > { %579 = vmatpush3.bf16.msra.mxu0 %v282_v29  ;;  %611 = vmatpush3.bf16.msra.mxu1 %v282_v29 }
  0x65   : > { %581 = vmatmul.mubr.bf16.vlgmr.msra.gmra.mxu0 %v259_v38  ;;  %589 = vmatmul.mubr.bf16.vlgmr.msra.gmra.mxu1 %v263_v39 }
  0x66   : > { %584 = vmatprep.mubr.bf16.mxu0 %v260_v40  ;;  %592 = vmatprep.mubr.bf16.mxu1 %v264_v41 }
  0x6d   : > { %585 = vmatmul.mubr.bf16.gmra.mxu0 %v261_v46  ;;  %593 = vmatmul.mubr.bf16.gmra.mxu1 %v265_v47 }
 0x125   : > { %v582_v49 = vpop.f32.mrf.mxu0  ;;  %v590_v50 = vpop.f32.mrf.mxu1 }
 0x126   : > { %v340_v51 = vadd.f32 %v582_v49, %v543_v48  ;;  %v372_v52 = vadd.f32 %v590_v50, %v543_v48 }
 0x127   : > { %v331_v53 = vpop.f32.mrf.mxu0  ;;  %v363_v54 = vpop.f32.mrf.mxu1 }
 0x128   : > { %396 = vst [vmem:[%s1012_s19 + $0x10] sm:$0xff] %v340_v51  ;;  %404 = vst [vmem:[%s1012_s19 + $0x50] sm:$0xff] %v372_v52  ;;  %v332_v55 = vadd.f32 %v543_v48, %v331_v53  ;;  %v364_v56 = vadd.f32 %v543_v48, %v363_v54 }
 0x129   : > { %v583_v57 = vpop.f32.mrf.mxu0  ;;  %v591_v58 = vpop.f32.mrf.mxu1 }
 0x12a   : > { %394 = vst [vmem:[%s1012_s19] sm:$0xff] %v332_v55  ;;  %402 = vst [vmem:[%s1012_s19 + $0x40] sm:$0xff] %v364_v56  ;;  %v343_v59 = vadd.f32 %v583_v57, %v543_v48  ;;  %v375_v60 = vadd.f32 %v591_v58, %v543_v48 }
 0x12b   : > { %v334_v61 = vpop.f32.mrf.mxu0  ;;  %v366_v62 = vpop.f32.mrf.mxu1 }
 0x12c   : > { %397 = vst [vmem:[%s1012_s19 + $0x18] sm:$0xff] %v343_v59  ;;  %405 = vst [vmem:[%s1012_s19 + $0x58] sm:$0xff] %v375_v60  ;;  %v335_v63 = vadd.f32 %v543_v48, %v334_v61  ;;  %v367_v0 = vadd.f32 %v543_v48, %v366_v62 }
 0x12d   : > { %v586_v1 = vpop.f32.mrf.mxu0  ;;  %v594_v2 = vpop.f32.mrf.mxu1 }
 0x12e   : > { %395 = vst [vmem:[%s1012_s19 + $0x8] sm:$0xff] %v335_v63  ;;  %403 = vst [vmem:[%s1012_s19 + $0x48] sm:$0xff] %v367_v0  ;;  %v356_v3 = vadd.f32 %v586_v1, %v543_v48  ;;  %v388_v4 = vadd.f32 %v594_v2, %v543_v48 }
 0x12f   : > { %v347_v5 = vpop.f32.mrf.mxu0  ;;  %v379_v6 = vpop.f32.mrf.mxu1 }
 0x130   : > { %400 = vst [vmem:[%s1012_s19 + $0x30] sm:$0xff] %v356_v3  ;;  %408 = vst [vmem:[%s1012_s19 + $0x70] sm:$0xff] %v388_v4  ;;  %v348_v7 = vadd.f32 %v543_v48, %v347_v5  ;;  %v380_v8 = vadd.f32 %v543_v48, %v379_v6 }
 0x131   : > { %v587_v9 = vpop.f32.mrf.mxu0  ;;  %v595_v10 = vpop.f32.mrf.mxu1 }
 0x132   : > { %398 = vst [vmem:[%s1012_s19 + $0x20] sm:$0xff] %v348_v7  ;;  %406 = vst [vmem:[%s1012_s19 + $0x60] sm:$0xff] %v380_v8  ;;  %v359_v11 = vadd.f32 %v587_v9, %v543_v48  ;;  %v391_v12 = vadd.f32 %v595_v10, %v543_v48 }
 0x133   : > { %v350_v13 = vpop.f32.mrf.mxu0  ;;  %v382_v14 = vpop.f32.mrf.mxu1 }
 0x134   : > { %401 = vst [vmem:[%s1012_s19 + $0x38] sm:$0xff] %v359_v11  ;;  %409 = vst [vmem:[%s1012_s19 + $0x78] sm:$0xff] %v391_v12  ;;  %v351_v15 = vadd.f32 %v543_v48, %v350_v13  ;;  %v383_v16 = vadd.f32 %v543_v48, %v382_v14 }
 0x136   : > { %399 = vst [vmem:[%s1012_s19 + $0x28] sm:$0xff] %v351_v15  ;;  %407 = vst [vmem:[%s1012_s19 + $0x68] sm:$0xff] %v383_v16 }
 0x137   : > { %758 = shalt.err (!%p755_p1)
}
 0x138   : > { %s759_s9 = scalar_lea.hbm %s1031_s15, 2048  ;;  %s763_s24 = scalar_lea.hbm %s1087_s3, 6144 }
 0x139   : > { %p760_p5 = scmp.ne.s32.totalorder %s1031_s15, %s759_s9  ;;  %p764_p11 = scmp.lt.s32.totalorder %s1031_s15, %s1087_s3 }
 0x13a   : > { %p765_p2 = scmp.lt.s32.totalorder %s763_s24, %s759_s9 }
 0x13b   : > { %p761_p7 = pnand %p760_p5, %p1105_p13 }
 0x13c   : > { %p766_p3 = por %p765_p2, %p764_p11 }
 0x13d   : > { %p762_p9 = pneg %p761_p7 }
 0x13f   : > { %p767_p12 = pnand %p766_p3, %p762_p9 }
 0x141   : > { %770 = shalt.err (!%p767_p12)
}
 0x142   : > { %s837_s25 = smov 128   ;;  %s838_s6 = smov 384  }
 0x143   : > { %s839_s19 = smov 8  }
 0x144   : > { %618 = dma.vmem_to_hbm [thread:$0]  (%p1105_p13), %s1033_s26, 2048, %s1031_s15, %s411_s27, %s837_s25, %s838_s6, %s839_s19  }
 0x145 PF: > { %s1106_s21 = sld [smem:[#allocation11_spill]]  ;;  %p635_p4 = scmp.ge.s32.totalorder %s829_s17, 2 }
 0x146   : > { %s1107_s28 = sld [smem:[#allocation12_spill]] }
 0x14b   : > { %s441_s4 = sand.u32 1, %s1106_s21  }
 0x14c   : > { %p1108_p6 = scmp.ne.s32.totalorder %s1107_s28, 0  ;;  %s442_s7 = scalar_lea.sflag [#allocation4], %s441_s4 }
 0x14e   : > { %p629_p8 = pnand %p635_p4, %p1108_p6 }
 0x150   : > { %p630_p10 = pneg %p629_p8 }
 0x152   : > { %804 = dma.done.wait (%p630_p10), %s442_s7, 2048  }
 0x153   : > { %806 = vsyncadd (%p630_p10), %s442_s7, 4294965248  ;;  %s20_s17 = sadd.s32 1, %s829_s17   ;;  %s1109_s23 = smov %s962_s12 }
 0x154   : > { %p17_p0 = scmp.ge.s32.totalorder %s20_s17, 5   ;;  %s1110_s12 = smov %s813_s13 }
 0x155   : > { %s1111_s13 = smov %s817_s14  ;;  %s1112_s14 = smov %s1109_s23 }
 0x156   : > { %s1113_s15 = smov %s825_s16  ;;  %s1114_s16 = smov %s1116_s30 }
 0x157   :  { %19 = sbr.rel (!%p17_p0) target bundleno = 7 (0x7), region = 86 }
 0x15c   :  { %447 = vsyncpa [#allocation3], 1 }
 0x15d   :  { %449 = vsyncpa [#allocation3 + $0x1], 1 }
 0x15e   :  { %450 = vsyncpa [#allocation6], 1 }
 0x15f   :  { %452 = vsyncpa [#allocation6 + $0x1], 1 }
 0x160   :  { %453 = vsyncpa [#allocation4], 1 }
 0x161   :  { %455 = vsyncpa [#allocation4 + $0x1], 1 }

</bundles_post_ra>
